<compile_context>
chip_gen: v7x
topology: tpu7x:2x2x1
jax: 0.10.0
libtpu: 0.0.40
codegen_flags: <defaults>
</compile_context>

<pallas_src>
import jax
import jax.numpy as jnp
from jax.experimental import pallas as pl
from jax.experimental.pallas import tpu as pltpu


def _dlinear_gemm_kernel(w_ref, b_ref, x_ref, o_ref):
    """One lane tile: (P, L) @ (L, tile_n) + (P, 1) -> (P, tile_n)."""
    o_ref[...] = (
        jnp.dot(w_ref[...], x_ref[...], preferred_element_type=jnp.float32)
        + b_ref[...]
    ).astype(o_ref.dtype)


def _moving_avg_matrix(L, kernel_size, dtype=jnp.float32):
    """A (L, L) with trend = A @ x: AvgPool1d(K, stride=1) with edge replication."""
    pad = (kernel_size - 1) // 2
    idx = jnp.arange(L)[:, None] + jnp.arange(kernel_size)[None, :] - pad   # (L, K)
    idx = jnp.clip(idx, 0, L - 1)
    onehot = (idx[:, :, None] == jnp.arange(L)[None, None, :]).astype(dtype)  # (L, K, L)
    return onehot.sum(axis=1) * (1.0 / kernel_size)                           # (L, L)


def _round_up(a, b):
    return (a + b - 1) // b * b


def dlinear_forward(x, w_seasonal, b_seasonal, w_trend, b_trend, *, kernel_size):
    """x: (B, L, C) f32; weights: (P, L); biases: (P,). Returns (B, P, C)."""
    # PyTorch AvgPool1d(K, stride=1, pad=(K-1)//2 via cat) only preserves L for odd K.
    assert kernel_size % 2 == 1, "DLinear moving_avg kernel_size must be odd"
    B, L, C = x.shape
    P = w_seasonal.shape[0]

    # Fold the (linear) series decomposition into an effective weight/bias.
    A = _moving_avg_matrix(L, kernel_size, x.dtype)                  # (L, L)
    w_eff = w_seasonal + jnp.dot(w_trend - w_seasonal, A)            # (P, L)
    b_eff = (b_seasonal + b_trend).reshape(P, 1).astype(x.dtype)     # (P, 1)
    w_eff = w_eff.astype(x.dtype)

    # Lane-dense layout: (B, L, C) -> (L, B*C), padded to a multiple of the tile.
    N = B * C
    tile_n = min(512, _round_up(N, 128))     # 128-aligned lanes; cap tile for VMEM
    n_pad = _round_up(N, tile_n)
    x2 = jnp.transpose(x, (1, 0, 2)).reshape(L, N)
    if n_pad != N:
        x2 = jnp.pad(x2, ((0, 0), (0, n_pad - N)))

    out = pl.pallas_call(
        _dlinear_gemm_kernel,
        out_shape=jax.ShapeDtypeStruct((P, n_pad), x.dtype),
        grid_spec=pltpu.PrefetchScalarGridSpec(
            num_scalar_prefetch=0,
            grid=(n_pad // tile_n,),
            in_specs=[
                pl.BlockSpec((P, L), lambda n: (0, 0)),        # W_eff (resident)
                pl.BlockSpec((P, 1), lambda n: (0, 0)),        # b_eff (resident)
                pl.BlockSpec((L, tile_n), lambda n: (0, n)),   # x lane tile
            ],
            out_specs=pl.BlockSpec((P, tile_n), lambda n: (0, n)),
        ),
        compiler_params=pltpu.CompilerParams(
            dimension_semantics=("parallel",),   # shard N tiles across TCs (v7x)
        ),
    )(w_eff, b_eff, x2)

    # (P, N) -> (B, P, C)
    out = out[:, :N].reshape(P, B, C)
    return jnp.transpose(out, (1, 0, 2))


def dlinear_reference(x, w_seasonal, b_seasonal, w_trend, b_trend, *, kernel_size):
    """Pure-JAX reference mirroring the PyTorch forward (explicit decomposition)."""
    B, L, C = x.shape
    pad = (kernel_size - 1) // 2
    front = jnp.repeat(x[:, 0:1, :], pad, axis=1)
    end = jnp.repeat(x[:, -1:, :], pad, axis=1)
    xp = jnp.concatenate([front, x, end], axis=1)            # (B, L+2p, C)
    windows = jnp.stack([xp[:, k:k + L, :] for k in range(kernel_size)], axis=0)
    trend = jnp.mean(windows, axis=0)                        # (B, L, C)
    seasonal = x - trend
    s_out = jnp.einsum("blc,pl->bpc", seasonal, w_seasonal) + b_seasonal[None, :, None]
    t_out = jnp.einsum("blc,pl->bpc", trend, w_trend) + b_trend[None, :, None]
    return s_out + t_out                                     # (B, P, C)


if __name__ == "__main__":
    # Small synthetic config (forecasting task, individual=False).
    B, C = 2, 4            # batch, n_features
    L = 16                 # history_len (seq_len)
    P = 8                  # pred_len
    K = 5                  # moving_avg kernel size (odd)

    key = jax.random.PRNGKey(0)
    kx, kws, kwt, kbs, kbt = jax.random.split(key, 5)

    x = jax.random.normal(kx, (B, L, C), dtype=jnp.float32)

    # Module __init__ sets weights to (1/seq_len)*ones; perturb slightly so the
    # seasonal/trend branches differ and the weight-fold path is actually
    # exercised against the explicit-decomposition reference.
    w_seasonal = (1.0 / L) + 0.05 * jax.random.normal(kws, (P, L), dtype=jnp.float32)
    w_trend = (1.0 / L) + 0.05 * jax.random.normal(kwt, (P, L), dtype=jnp.float32)
    bound = 1.0 / (L ** 0.5)
    b_seasonal = jax.random.uniform(kbs, (P,), jnp.float32, -bound, bound)
    b_trend = jax.random.uniform(kbt, (P,), jnp.float32, -bound, bound)

    out = dlinear_forward(x, w_seasonal, b_seasonal, w_trend, b_trend, kernel_size=K)
    out = jax.block_until_ready(out)

    ref = dlinear_reference(x, w_seasonal, b_seasonal, w_trend, b_trend, kernel_size=K)
    assert out.shape == (B, P, C), out.shape
    assert jnp.allclose(out, ref, atol=1e-5, rtol=1e-5), "mismatch vs reference"

    print("KERNEL_OK")
</pallas_src>

<mosaic_0001>
module attributes {stable_mosaic.version = 11 : i64} {
  func.func @_dlinear_gemm_kernel(%arg0: i32, %arg1: memref<8x16xf32, #tpu.memory_space<vmem>>, %arg2: memref<8x1xf32, #tpu.memory_space<vmem>>, %arg3: memref<16x128xf32, #tpu.memory_space<vmem>>, %arg4: memref<8x128xf32, #tpu.memory_space<vmem>>) attributes {dimension_semantics = [#tpu.dimension_semantics<parallel>], iteration_bounds = array<i64: 1>, scalar_prefetch = 0 : i64, scratch_operands = 0 : i64, tpu.core_type = #tpu.core_type<tc>, window_params = [{pipeline_mode = #tpu.pipeline_mode<synchronous>, transform_indices = @transform_0, window_bounds = array<i64: 8, 16>}, {pipeline_mode = #tpu.pipeline_mode<synchronous>, transform_indices = @transform_1, window_bounds = array<i64: 8, 1>}, {transform_indices = @transform_2, window_bounds = array<i64: 16, 128>}, {transform_indices = @transform_3, window_bounds = array<i64: 8, 128>}]} {
    %c0 = arith.constant 0 : index
    %c0_0 = arith.constant 0 : index
    %0 = vector.load %arg1[%c0, %c0_0] : memref<8x16xf32, #tpu.memory_space<vmem>>, vector<8x16xf32>
    %c0_1 = arith.constant 0 : index
    %c0_2 = arith.constant 0 : index
    %1 = vector.load %arg3[%c0_1, %c0_2] : memref<16x128xf32, #tpu.memory_space<vmem>>, vector<16x128xf32>
    %cst = arith.constant dense<0.000000e+00> : vector<8x128xf32>
    %2 = tpu.matmul %0, %1, %cst {dimension_numbers = #tpu.dot_dimension_numbers<[1], [0], [0], [1], [0, 0, 1, 1], [], []>} : vector<8x16xf32>, vector<16x128xf32>, vector<8x128xf32> -> vector<8x128xf32>
    %c0_3 = arith.constant 0 : index
    %c0_4 = arith.constant 0 : index
    %3 = vector.load %arg2[%c0_3, %c0_4] : memref<8x1xf32, #tpu.memory_space<vmem>>, vector<8x1xf32>
    %4 = vector.broadcast %3 : vector<8x1xf32> to vector<8x128xf32>
    %5 = arith.addf %2, %4 : vector<8x128xf32>
    %c0_5 = arith.constant 0 : index
    %c0_6 = arith.constant 0 : index
    %6 = vector.load %arg4[%c0_5, %c0_6] : memref<8x128xf32, #tpu.memory_space<vmem>>, vector<8x128xf32>
    tpu.vector_store %arg4[%c0_5, %c0_6], %5 {strides = array<i32>} : memref<8x128xf32, #tpu.memory_space<vmem>>, vector<8x128xf32>,
    return
  }
  func.func @transform_0(%arg0: i32) -> (i32, i32) {
    %c0_i32 = arith.constant 0 : i32
    %c0_i32_0 = arith.constant 0 : i32
    %c0_i32_1 = arith.constant 0 : i32
    return %c0_i32, %c0_i32_0 : i32, i32
  }
  func.func @transform_1(%arg0: i32) -> (i32, i32) {
    %c0_i32 = arith.constant 0 : i32
    %c0_i32_0 = arith.constant 0 : i32
    %c0_i32_1 = arith.constant 0 : i32
    return %c0_i32, %c0_i32_0 : i32, i32
  }
  func.func @transform_2(%arg0: i32) -> (i32, i32) {
    %c0_i32 = arith.constant 0 : i32
    %c0_i32_0 = arith.constant 0 : i32
    return %c0_i32, %arg0 : i32, i32
  }
  func.func @transform_3(%arg0: i32) -> (i32, i32) {
    %c0_i32 = arith.constant 0 : i32
    %c0_i32_0 = arith.constant 0 : i32
    return %c0_i32, %arg0 : i32, i32
  }
}

</mosaic_0001>

<bundles_post_ra>
// kernel: tpu_custom_call.1
= control target key start
LH: loop header
LB: loop body
LE: loop exit
PB: predicated region body
PF: predicated region fallthrough
CT: control target
= control target key end

     0   :  { %8 = vsyncpa [#allocation3], 0  ;;  %s254_s0 = inlined_call_operand.hbm [shape: f32[8,16], index: 0, kind: input, shape index: {}]   ;;  %s255_s1 = inlined_call_operand.vmem [shape: f32[8,1], index: 1, kind: input, shape index: {}]   ;;  %s256_s2 = inlined_call_operand.vmem [shape: f32[16,128], index: 2, kind: input, shape index: {}]   ;;  %s257_s3 = inlined_call_operand.hbm [shape: f32[8,128], index: 3, kind: output, shape index: {}]  }
   0x1   :  { %9 = vsyncpa [#allocation4], 0  ;;  %s195_s12 = smov [#allocation2]   ;;  %s147_s16 = scalar_lea.hbm %s254_s0, 128 }
   0x2   :  { %s16_s13 = sshll.u32 %s195_s12, 4  ;;  %p148_p0 = scmp.ne.s32.totalorder %s254_s0, %s147_s16  ;;  %s17_s13 = int_to_ptr.vmem [resolvable:$true] %s16_s13 }
   0x3   :  { %p151_p1 = scmp.lt.u32.totalorder %s147_s16, %s254_s0 }
   0x5   :  { %p153_p2 = pnand %p151_p1, %p148_p0 }
   0x7   :  { %156 = shalt.err (!%p153_p2)
}
   0x8   :  { %s157_s21 = scalar_lea.vmem %s17_s13, 128  ;;  %p162_p4 = scmp.lt.s32.totalorder %s17_s13, %s17_s13 }
   0x9   :  { %p158_p3 = scmp.ne.s32.totalorder %s17_s13, %s157_s21  ;;  %p163_p5 = scmp.lt.s32.totalorder %s157_s21, %s157_s21 }
   0xb   :  { %p164_p6 = por %p163_p5, %p162_p4 }
   0xd   :  { %p165_p7 = pnand %p164_p6, %p158_p3 }
   0xf   :  { %168 = shalt.err (!%p165_p7)
}
  0x10   :  { %19 = dma.hbm_to_vmem [thread:$0]  %s254_s0, 128, %s17_s13, [#allocation3]  }
  0x11   :  { %191 = dma.done.wait [#allocation3], 128  }
  0x12   :  { %192 = vsyncadd [#allocation3], 4294967168  ;;  %v196_v0 = vmov 0.0|0.0   ;;  %vm197_vm0 = vmmov 0   ;;  %v198_v1 = vmov 0.0   ;;  %v199_v2 = vmov 0  }
  0x13   :  { %137 = vmatprep.subr.bf16.mxu0 %v196_v0  ;;  %134 = vmatprep.mubr.msk.f32.mxu0 %vm197_vm0, %v198_v1  ;;  %v28_v3 = vld [vmem:[%s256_s2] sm:$0xff]  ;;  %v29_v4 = vld [vmem:[%s256_s2 + $0x8] sm:$0xff]  ;;  %vm36_vm1 = vcmask 130048   ;;  %s200_s29 = smov [#allocation5]  }
  0x14   :  { %146 = vset.pattern.permute.xlu0 %v199_v2  ;;  %v138_v5 = vpack.c.bf16 %v29_v4, %v28_v3  ;;  %v30_v6 = vld [vmem:[%s255_s1] sm:$0xff]  ;;  %s117_s30 = sshll.u32 %s200_s29, 4  ;;  %s118_s30 = int_to_ptr.vmem [resolvable:$true] %s117_s30 }
  0x15   :  { %33 = vperm.xlu0 %146, %v30_v6   ;;  %v27_v7 = vld [vmem:[#allocation2] sm:$0xff]  ;;  %s169_s4 = scalar_lea.vmem %s118_s30, 128  ;;  %p174_p9 = scmp.lt.s32.totalorder %s118_s30, %s118_s30 }
  0x16   :  { %139 = vmatpush3.bf16.msra.mxu0 %v138_v5  ;;  %p170_p8 = scmp.ne.s32.totalorder %s118_s30, %s169_s4  ;;  %p175_p10 = scmp.lt.s32.totalorder %s169_s4, %s169_s4 }
  0x18   :  { %p176_p11 = por %p175_p10, %p174_p9 }
  0x19   :  { %135 = vmatmul.mubr.msk.f32.vlgmr.msra.gmra.mrb[0].mxu0 %vm36_vm1, %v27_v7 }
  0x1a   :  { %p177_p12 = pnand %p176_p11, %p170_p8 }
  0x94   :  { %v34_v8 = vpop.permute.xlu0 %33 }
  0xec   :  { %v106_v9 = vpop.f32.mrb[0].mxu0 }
  0xed   :  { %v107_v10 = vadd.f32 %v106_v9, %v34_v8  ;;  %v136_v11 = vpop.f32.mrb[1].mxu0 }
  0xef   :  { %110 = vst [vmem:[#allocation5] sm:$0xff] %v107_v10 }
  0xf0   :  { %180 = shalt.err (!%p177_p12)
}
  0xf1   :  { %s181_s5 = scalar_lea.hbm %s257_s3, 128 }
  0xf2   :  { %p182_p13 = scmp.ne.s32.totalorder %s257_s3, %s181_s5  ;;  %p185_p0 = scmp.lt.u32.totalorder %s181_s5, %s257_s3 }
  0xf4   :  { %p187_p1 = pnand %p185_p0, %p182_p13 }
  0xf6   :  { %190 = shalt.err (!%p187_p1)
}
  0xf7   :  { %120 = dma.vmem_to_hbm [thread:$0]  %s118_s30, 128, %s257_s3, [#allocation4]  }
  0xf8   :  { %193 = dma.done.wait [#allocation4], 128  }
  0xf9   :  { %194 = vsyncadd [#allocation4], 4294967168 }
  0xfa   :  { %124 = vsyncpa [#allocation3], 1 }
  0xfb   :  { %125 = vsyncpa [#allocation4], 1 }

</bundles_post_ra>
